<compile_context>
chip_gen: v7x
topology: tpu7x:2x2x1
jax: 0.10.0
libtpu: 0.0.40
codegen_flags: <defaults>
</compile_context>

<pallas_src>
import math
import functools

import jax
import jax.numpy as jnp
from jax import lax
from jax.experimental import pallas as pl
from jax.experimental.pallas import tpu as pltpu

_LANE = 128


def _pe_dropout_kernel(seed_ref, x_ref, pe_ref, o_ref, *,
                       keep_threshold, keep_prob, apply_dropout, total_cols):
    """out = dropout(x + pe). x/out tiles are (tb, tc); pe tile is (1, tc)."""
    # f32 accumulation, single cast at the store (matches fp32-add-then-cast).
    y = x_ref[...].astype(jnp.float32) + pe_ref[...].astype(jnp.float32)
    if apply_dropout:
        tb, tc = x_ref.shape
        # Grid = (col_tiles, row_tiles): axis 0 = column tile j, axis 1 = row tile i.
        # Fold the tile offsets into a single scalar base (scalar unit, free slot).
        # NOTE: element ids are int32 and wrap for tensors with >= 2^31 elements;
        # ids stay distinct mod 2^32 so the mask remains valid/deterministic.
        base = (pl.program_id(1) * jnp.int32(tb * total_cols)
                + pl.program_id(0) * jnp.int32(tc))
        r = lax.broadcasted_iota(jnp.int32, (tb, tc), 0)
        c = lax.broadcasted_iota(jnp.int32, (tb, tc), 1)
        h = base + r * jnp.int32(total_cols) + c
        # murmur3-style finalizer folded with the seed (unique per element).
        h = h ^ (seed_ref[0] * jnp.int32(-1640531527))          # 0x9E3779B9
        h = h ^ lax.shift_right_logical(h, 16)
        h = h * jnp.int32(-2048144789)                          # 0x85EBCA6B
        h = h ^ lax.shift_right_logical(h, 13)
        h = h * jnp.int32(-1028477387)                          # 0xC2B2AE35
        h = h ^ lax.shift_right_logical(h, 16)
        # Pure int32 threshold on the low 24 bits (no int->f32 convert / f32 mul).
        keep = (h & jnp.int32(0x00FFFFFF)) < jnp.int32(keep_threshold)
        y = jnp.where(keep, y * jnp.float32(1.0 / keep_prob), jnp.float32(0.0))
    o_ref[...] = y.astype(o_ref.dtype)


def _pick_tile(n, target, align):
    """Largest divisor of n that is a multiple of `align` and <= target; else n (full)."""
    best = None
    cand = align
    limit = min(n, target)
    while cand <= limit:
        if n % cand == 0:
            best = cand
        cand += align
    return best if best is not None else n


def make_positional_encoding(d_model, max_len=5000, dtype=jnp.float32):
    """Deterministic PE buffer, identical math to the PyTorch __init__ (shape (1, L, D))."""
    if d_model % 2 != 0:
        raise ValueError("d_model must be even (same requirement as the PyTorch module).")
    position = jnp.arange(0.0, max_len, dtype=jnp.float32)[:, None]            # (L, 1)
    div_term = jnp.exp(jnp.arange(0.0, d_model, 2.0, dtype=jnp.float32)
                       * (-(math.log(10000.0) / d_model)))                     # (D/2,)
    sin = jnp.sin(position * div_term)                                         # (L, D/2)
    cos = jnp.cos(position * div_term)                                         # (L, D/2)
    pe = jnp.stack([sin, cos], axis=-1).reshape(max_len, d_model)              # interleave even/odd
    return pe[None, :, :].astype(dtype)                                        # (1, L, D)


def positional_encoding_forward(x, pe, *, dropout_p, seed, training):
    """x: (B, S, D).  Returns dropout(x + pe[:, :S]) with the module's semantics."""
    B, S, D = x.shape
    _, max_len, Dp = pe.shape
    assert Dp == D and S <= max_len

    if pe.dtype != x.dtype:
        pe = pe.astype(x.dtype)   # callers can hoist this by building pe in x.dtype

    cols_total = S * D
    x2d = x.reshape(B, cols_total)                      # contiguous -> free reshape

    # ---- pad flattened columns to a lane multiple (keeps tiles lane-dense) ----
    cols_eff = ((cols_total + _LANE - 1) // _LANE) * _LANE
    if cols_eff != cols_total:
        x2d = jnp.pad(x2d, ((0, 0), (0, cols_eff - cols_total)))
        pe2d = pe.reshape(1, max_len * D)[:, :cols_total]
        pe2d = jnp.pad(pe2d, ((0, 0), (0, cols_eff - cols_total)))
    else:
        # Row-major layout => the first S*D columns of the flattened pe are exactly
        # pe[:, :S, :]; the BlockSpec window reads them directly (no wrapper slice).
        pe2d = pe.reshape(1, max_len * D)

    # ---- VMEM-aware tile selection -----------------------------------------
    try:
        vmem_cap = pltpu.get_tpu_info().vmem_capacity_bytes
    except Exception:
        vmem_cap = 64 * 1024 * 1024                     # conservative (v7x-sized)
    # ~4 MiB per buffer (amortizes per-step overhead at v7x HBM speed) but
    # never more than vmem/16: x/out are double-buffered, plus pe + headroom.
    tile_bytes = int(max(1 << 20, min(4 << 20, vmem_cap // 16)))
    vmem_limit = int(min(max(32 << 20, (vmem_cap * 3) // 4), 48 << 20))

    itemsize = jnp.dtype(x.dtype).itemsize
    sub_align = {4: 8, 2: 16, 1: 32}.get(itemsize, 8)   # dtype-aware sublane packing

    tb_target = max(sub_align,
                    (tile_bytes // max(1, cols_eff * itemsize)) // sub_align * sub_align)
    tb = _pick_tile(B, tb_target, sub_align)            # sublane-aligned row tile (or full B)
    tc_target = max(_LANE, (tile_bytes // max(1, tb * itemsize)) // _LANE * _LANE)
    tc = _pick_tile(cols_eff, tc_target, _LANE)         # lane-dense column tile

    n_col = cols_eff // tc
    n_row = B // tb
    # Megacore (v7x has 2 TCs): keep >=2 tiles on a parallel axis when the work allows.
    if n_col == 1 and n_row == 1 and cols_eff >= 2 * _LANE:
        tc = _pick_tile(cols_eff, cols_eff // 2, _LANE)
        n_col = cols_eff // tc

    seed_arr = jnp.asarray([seed], dtype=jnp.int32)
    keep_prob = 1.0 - float(dropout_p)
    apply_dropout = bool(training) and float(dropout_p) > 0.0
    kernel = functools.partial(
        _pe_dropout_kernel,
        keep_threshold=int(keep_prob * (1 << 24)),
        keep_prob=keep_prob,
        apply_dropout=apply_dropout,
        total_cols=cols_eff,
    )

    # Grid: column-tile axis outermost so the pe tile (block index (0, j)) is
    # constant across the inner batch-tile loop and is not re-DMA'd per row.
    out2d = pl.pallas_call(
        kernel,
        out_shape=jax.ShapeDtypeStruct((B, cols_eff), x.dtype),
        grid=(n_col, n_row),
        in_specs=[
            pl.BlockSpec(memory_space=pltpu.SMEM),                 # seed scalar
            pl.BlockSpec((tb, tc), lambda j, i: (i, j)),           # x tile
            pl.BlockSpec((1, tc), lambda j, i: (0, j)),            # pe tile (window of buffer)
        ],
        out_specs=pl.BlockSpec((tb, tc), lambda j, i: (i, j)),
        compiler_params=pltpu.CompilerParams(
            dimension_semantics=("parallel", "parallel"),          # elementwise: megacore-shardable
            vmem_limit_bytes=vmem_limit,
        ),
        # NOTE: input_output_aliases={1: 0} would reuse x's HBM buffer, but it
        # donates x; left off so callers may keep using x afterwards.
    )(seed_arr, x2d, pe2d)

    out2d = out2d[:, :cols_total] if cols_eff != cols_total else out2d
    return out2d.reshape(B, S, D)


if __name__ == "__main__":
    # Small shapes consistent with the module's forward: (batch, seq, d_model)
    B, S, D = 2, 8, 32
    dropout_p = 0.1
    max_len = 64

    key = jax.random.PRNGKey(0)
    x = jax.random.normal(key, (B, S, D), dtype=jnp.float32)
    pe = make_positional_encoding(D, max_len=max_len)

    # Eval mode: dropout is identity -> must match x + pe[:, :S] exactly.
    out_eval = positional_encoding_forward(x, pe, dropout_p=dropout_p, seed=0, training=False)
    jax.block_until_ready(out_eval)
    ref = x + pe[:, :S, :]
    assert out_eval.shape == (B, S, D)
    assert jnp.allclose(out_eval, ref, atol=1e-6), "eval-mode mismatch"

    # Training mode: kept elements equal (x + pe) / keep_prob, dropped are 0.
    out_train = positional_encoding_forward(x, pe, dropout_p=dropout_p, seed=1234, training=True)
    jax.block_until_ready(out_train)
    assert out_train.shape == (B, S, D)
    keep_prob = 1.0 - dropout_p
    scaled_ref = ref / keep_prob
    kept = out_train != 0
    assert bool(jnp.all(jnp.where(kept, jnp.abs(out_train - scaled_ref) < 1e-5, True))), \
        "train-mode kept-element mismatch"

    # Non-128-multiple S*D exercises the lane-padding path (no full-width fallback).
    D2, S2 = 6, 5
    pe2 = make_positional_encoding(D2, max_len=16)
    x2 = jax.random.normal(jax.random.PRNGKey(1), (B, S2, D2), dtype=jnp.float32)
    out2 = positional_encoding_forward(x2, pe2, dropout_p=dropout_p, seed=0, training=False)
    jax.block_until_ready(out2)
    assert out2.shape == (B, S2, D2)
    assert jnp.allclose(out2, x2 + pe2[:, :S2, :], atol=1e-6), "padded-path mismatch"

    print("KERNEL_OK")
</pallas_src>

<mosaic_0001>
module attributes {stable_mosaic.version = 11 : i64} {
  func.func @_pe_dropout_kernel(%arg0: i32, %arg1: i32, %arg2: memref<1xi32, #tpu.memory_space<smem>>, %arg3: memref<2x128xf32, #tpu.memory_space<vmem>>, %arg4: memref<1x128xf32, #tpu.memory_space<vmem>>, %arg5: memref<2x128xf32, #tpu.memory_space<vmem>>) attributes {dimension_semantics = [#tpu.dimension_semantics<parallel>, #tpu.dimension_semantics<parallel>], iteration_bounds = array<i64: 2, 1>, scalar_prefetch = 0 : i64, scratch_operands = 0 : i64, tpu.core_type = #tpu.core_type<tc>, window_params = [{transform_indices = @transform_0, window_bounds = array<i64: 1>}, {transform_indices = @transform_1, window_bounds = array<i64: 2, 128>}, {transform_indices = @transform_2, window_bounds = array<i64: 1, 128>}, {transform_indices = @transform_3, window_bounds = array<i64: 2, 128>}]} {
    %c0 = arith.constant 0 : index
    %c0_0 = arith.constant 0 : index
    %0 = vector.load %arg3[%c0, %c0_0] : memref<2x128xf32, #tpu.memory_space<vmem>>, vector<2x128xf32>
    %c0_1 = arith.constant 0 : index
    %c0_2 = arith.constant 0 : index
    %1 = vector.load %arg4[%c0_1, %c0_2] : memref<1x128xf32, #tpu.memory_space<vmem>>, vector<1x128xf32>
    %2 = vector.broadcast %1 : vector<1x128xf32> to vector<2x128xf32>
    %3 = arith.addf %0, %2 : vector<2x128xf32>
    %c0_3 = arith.constant 0 : index
    %c0_4 = arith.constant 0 : index
    %4 = vector.load %arg5[%c0_3, %c0_4] : memref<2x128xf32, #tpu.memory_space<vmem>>, vector<2x128xf32>
    tpu.vector_store %arg5[%c0_3, %c0_4], %3 {strides = array<i32>} : memref<2x128xf32, #tpu.memory_space<vmem>>, vector<2x128xf32>,
    return
  }
  func.func @transform_0(%arg0: i32, %arg1: i32) -> i32 {
    %c0_i32 = arith.constant 0 : i32
    %c0_i32_0 = arith.constant 0 : i32
    return %c0_i32 : i32
  }
  func.func @transform_1(%arg0: i32, %arg1: i32) -> (i32, i32) {
    %c0_i32 = arith.constant 0 : i32
    return %arg1, %arg0 : i32, i32
  }
  func.func @transform_2(%arg0: i32, %arg1: i32) -> (i32, i32) {
    %c0_i32 = arith.constant 0 : i32
    %c0_i32_0 = arith.constant 0 : i32
    return %c0_i32, %arg0 : i32, i32
  }
  func.func @transform_3(%arg0: i32, %arg1: i32) -> (i32, i32) {
    %c0_i32 = arith.constant 0 : i32
    return %arg1, %arg0 : i32, i32
  }
}

</mosaic_0001>

<bundles_post_ra>
// kernel: tpu_custom_call.1
= control target key start
LH: loop header
LB: loop body
LE: loop exit
PB: predicated region body
PF: predicated region fallthrough
CT: control target
= control target key end

     0   :  { %9 = vsyncpa [#allocation4], 0  ;;  %s835_s0 = inlined_call_operand.<no memory space> [shape: s32[1], index: 0, kind: input, shape index: {}]   ;;  %s836_s1 = inlined_call_operand.hbm [shape: f32[2,256], index: 1, kind: input, shape index: {}]   ;;  %s837_s2 = inlined_call_operand.hbm [shape: f32[1,2048], index: 2, kind: input, shape index: {}]   ;;  %s838_s3 = inlined_call_operand.hbm [shape: f32[2,256], index: 3, kind: output, shape index: {}]  }
   0x1   :  { %11 = vsyncpa [#allocation4 + $0x1], 0 }
   0x2   :  { %12 = vsyncpa [#allocation7], 0 }
   0x3   :  { %14 = vsyncpa [#allocation7 + $0x1], 0 }
   0x4   :  { %15 = vsyncpa [#allocation5], 0 }
   0x5   :  { %17 = vsyncpa [#allocation5 + $0x1], 0  ;;  %s620_s12 = smov 0   ;;  %s622_s13 = smov 0  }
   0x6   :  { %s624_s0 = smov 0   ;;  %s626_s14 = smov 0  }
   0x7   :  { %s628_s15 = smov 0   ;;  %s630_s16 = smov 0  }
   0x8 LB: > { %s367_s17 = sadd.s32 4294967295, %s595_s16   ;;  %s368_s18 = sadd.s32 4294967294, %s595_s16   ;;  %s595_s16 = sphi %s630_s16, %s23_s16   ;;  %s591_s15 = sphi %s628_s15, %s858_s15   ;;  %s587_s14 = sphi %s626_s14, %s857_s14   ;;  %s583_s0 = sphi %s624_s0, %s856_s0   ;;  %s579_s13 = sphi %s622_s13, %s855_s13   ;;  %s575_s12 = sphi %s620_s12, %s854_s12  }
   0x9   : > { %s35_s19 = sadd.s32 1, %s591_s15  ;;  %s65_s20 = sadd.s32 1, %s583_s0 }
   0xa   : > { %p37_p0 = scmp.ge.s32.totalorder %s35_s19, 2  ;;  %p72_p1 = scmp.ne.s32.totalorder %s583_s0, %s579_s13 }
   0xb   : > { %p73_p2 = scmp.eq.s32.totalorder %s595_s16, 0  ;;  %p78_p3 = scmp.ne.s32.totalorder %s579_s13, %s575_s12 }
   0xc   : > { %s860_s19 = smov (%p37_p0, %s35_s19), 0  ;;  %p79_p5 = scmp.eq.s32.totalorder %s367_s17, 0 }
   0xd   : > { %p661_p4 = por %p73_p2, %p72_p1  ;;  %s61_s22 = ssub.s32 %s591_s15, %s860_s19 }
   0xe   : > { %p130_p6 = scmp.eq.s32.totalorder %s367_s17, 1  ;;  %p63_p7 = scmp.eq.s32.totalorder %s61_s22, 0 }
   0xf   : > { %p667_p8 = por %p79_p5, %p78_p3  ;;  %p136_p10 = scmp.eq.s32.totalorder %s368_s18, 1 }
  0x10   : > { %p671_p9 = por %p130_p6, %p72_p1  ;;  %p399_p13 = scmp.lt.s32.totalorder %s595_s16, 2 }
  0x11   : > { %s842_s23 = scalar_select %p667_p8, 1, 0 }
  0x12   : > { %s843_s24 = scalar_select %p671_p9, 1, 0 }
  0x13   : > { %s676_s25 = scalar_select %p63_p7, %s583_s0, %s65_s20  }
  0x14   : > { %p678_p11 = por %p136_p10, %p78_p3  ;;  %s685_s27 = sand.u32 1, %s583_s0  }
  0x15   : > { %s371_s28 = sshll.u32 %s685_s27, 1  ;;  %s372_s29 = sshll.u32 %s591_s15, 5 }
  0x16   : > { %s844_s26 = scalar_select %p678_p11, 1, 0 }
  0x17   : > { %s692_s5 = scalar_lea.hbm %s836_s1, %s372_s29  ;;  %s163_s6 = scalar_lea.vmem [#allocation3], %s371_s28 }
  0x18   : > { %s172_s7 = sshll.u32 %s163_s6, 4  ;;  %p698_p0 = pnand %p399_p13, %p661_p4  ;;  %s694_s7 = int_to_ptr.vmem [resolvable:$true] %s172_s7 }
  0x19   : > { %s160_s9 = scalar_lea.sflag [#allocation4], %s685_s27  ;;  %s449_s10 = scalar_lea.hbm %s692_s5, 32 }
  0x1a   : > { %p450_p3 = scmp.ne.s32.totalorder %s692_s5, %s449_s10  ;;  %p451_p5 = pneg %p698_p0 }
  0x1b   : > { %s454_s18 = scalar_lea.hbm %s836_s1, 64  ;;  %p455_p4 = scmp.lt.u32.totalorder %s692_s5, %s836_s1 }
  0x1c   : > { %p452_p6 = pnand %p451_p5, %p450_p3  ;;  %p456_p10 = scmp.lt.u32.totalorder %s454_s18, %s449_s10 }
  0x1d   : > { %p458_p12 = scmp.lt.u32.totalorder %s449_s10, %s692_s5 }
  0x1e   : > { %p453_p7 = pneg %p452_p6  ;;  %p457_p13 = por %p456_p10, %p455_p4 }
  0x20   : > { %p459_p1 = por %p458_p12, %p457_p13 }
  0x22   : > { %p460_p2 = pnand %p459_p1, %p453_p7 }
  0x24   : > { %463 = shalt.err (!%p460_p2)
}
  0x25   : > { %s464_s22 = scalar_lea.vmem %s694_s7, 32  ;;  %s597_s28 = smov [#allocation3]  }
  0x26   : > { %p465_p3 = scmp.ne.s32.totalorder %s694_s7, %s464_s22  ;;  %s469_s29 = sshll.u32 %s597_s28, 4  ;;  %s470_s29 = int_to_ptr.vmem [resolvable:$false] %s469_s29 }
  0x27   : > { %s471_s30 = scalar_lea.vmem %s470_s29, 64  ;;  %p472_p9 = scmp.lt.s32.totalorder %s694_s7, %s470_s29 }
  0x28   : > { %p467_p6 = pnand %p465_p3, %p451_p5  ;;  %p473_p4 = scmp.lt.s32.totalorder %s471_s30, %s464_s22 }
  0x2a   : > { %p468_p11 = pneg %p467_p6  ;;  %p474_p10 = por %p473_p4, %p472_p9 }
  0x2c   : > { %p475_p12 = pnand %p474_p10, %p468_p11 }
  0x2e   : > { %478 = shalt.err (!%p475_p12)
}
  0x2f   : > { %391 = dma.hbm_to_vmem [thread:$0]  (!%p698_p0), %s692_s5, 32, %s694_s7, %s160_s9  }
  0x30   : > { %p846_p1 = scmp.lt.s32.totalorder %s595_s16, 3  ;;  %p847_p2 = scmp.ge.s32.totalorder %s595_s16, 1 }
  0x31   : > { %s373_s6 = sshll.u32 %s591_s15, 4  ;;  %s182_s10 = scalar_lea.vmem [#allocation6], %s685_s27 }
  0x32   : > { %p734_p7 = pnand %p847_p2, %p846_p1  ;;  %s189_s11 = sshll.u32 %s182_s10, 4  ;;  %s190_s11 = int_to_ptr.vmem [resolvable:$true] %s189_s11 }
  0x33   : > { %s743_s20 = scalar_lea.hbm %s837_s2, %s373_s6  ;;  %s180_s5 = scalar_lea.sflag [#allocation7], %s685_s27 }
  0x34   : > { %s848_s4 = scalar_select %p734_p7, 1, 0 }
  0x35   : > { %s479_s7 = scalar_lea.hbm %s743_s20, 16  ;;  %s484_s22 = scalar_lea.hbm %s837_s2, 256 }
  0x36   : > { %p480_p9 = scmp.ne.s32.totalorder %s743_s20, %s479_s7  ;;  %p485_p3 = scmp.lt.u32.totalorder %s743_s20, %s837_s2 }
  0x37   : > { %p486_p6 = scmp.lt.u32.totalorder %s484_s22, %s479_s7  ;;  %p488_p10 = scmp.lt.u32.totalorder %s479_s7, %s743_s20 }
  0x38   : > { %p482_p11 = pnand %p480_p9, %p451_p5 }
  0x39   : > { %p487_p4 = por %p486_p6, %p485_p3 }
  0x3a   : > { %p483_p13 = pneg %p482_p11 }
  0x3b   : > { %p489_p12 = por %p488_p10, %p487_p4 }
  0x3d   : > { %p490_p1 = pnand %p489_p12, %p483_p13 }
  0x3f   : > { %493 = shalt.err (!%p490_p1)
}
  0x40   : > { %s494_s27 = scalar_lea.vmem %s190_s11, 16  ;;  %s598_s30 = smov [#allocation6]  }
  0x41   : > { %p495_p2 = scmp.ne.s32.totalorder %s190_s11, %s494_s27  ;;  %s499_s6 = sshll.u32 %s598_s30, 4  ;;  %s500_s6 = int_to_ptr.vmem [resolvable:$false] %s499_s6 }
  0x42   : > { %s501_s10 = scalar_lea.vmem %s500_s6, 32  ;;  %p502_p8 = scmp.lt.s32.totalorder %s190_s11, %s500_s6 }
  0x43   : > { %p497_p9 = pnand %p495_p2, %p451_p5  ;;  %p503_p7 = scmp.lt.s32.totalorder %s501_s10, %s494_s27 }
  0x45   : > { %p498_p11 = pneg %p497_p9  ;;  %p504_p3 = por %p503_p7, %p502_p8 }
  0x47   : > { %p505_p6 = pnand %p504_p3, %p498_p11 }
  0x49   : > { %508 = shalt.err (!%p505_p6)
}
  0x4a   : > { %394 = dma.hbm_to_vmem [thread:$0]  (!%p698_p0), %s743_s20, 16, %s190_s11, %s180_s5  }
  0x4b   : > { %p849_p13 = scmp.ne.s32.totalorder %s848_s4, 0 }
  0x4c   : > { %s768_s17 = sand.u32 (!%p849_p13), 1, %s579_s13   ;;  %p850_p5 = scmp.ne.s32.totalorder (!%p849_p13), %s842_s23, 0 }
  0x4d   : > { %198 = sbr.rel (%p849_p13) target bundleno = 113 (0x71), region = 32  ;;  %s375_s18 = sshll.u32 (!%p849_p13), %s768_s17, 1 }
  0x4e   : > { %s201_s7 = scalar_lea.sflag (!%p849_p13), [#allocation4], %s768_s17  ;;  %s204_s9 = scalar_lea.vmem (!%p849_p13), [#allocation3], %s375_s18 }
  0x54   : > { %562 = dma.done.wait (%p850_p5), %s201_s7, 32  }
  0x55   : > { %564 = vsyncadd (%p850_p5), %s201_s7, 4294967264  ;;  %s210_s8 = scalar_lea.sflag [#allocation7], %s768_s17  ;;  %s212_s4 = scalar_lea.vmem [#allocation6], %s768_s17 }
  0x56   : > { %566 = dma.done.wait (%p850_p5), %s210_s8, 16  }
  0x57   : > { %568 = vsyncadd (%p850_p5), %s210_s8, 4294967280  ;;  %s238_s11 = scalar_lea.vmem [#allocation8], %s375_s18  ;;  %s379_s5 = sshll.u32 %s587_s14, 5  ;;  %v239_v0 = vld [vmem:[%s204_s9] sm:$0x3] }
  0x58   : > { %s265_s20 = sshll.u32 %s238_s11, 4  ;;  %v377_v1 = vld [vmem:[%s212_s4] ss:$0 sm:$0xff]  ;;  %s788_s28 = scalar_lea.hbm %s838_s3, %s379_s5  ;;  %s783_s20 = int_to_ptr.vmem [resolvable:$true] %s265_s20 }
  0x59   : > { %v247_v2 = vadd.f32 %v377_v1, %v239_v0  ;;  %s250_s23 = scalar_lea.sflag [#allocation5], %s768_s17  ;;  %s509_s29 = scalar_lea.vmem %s783_s20, 32 }
  0x5a   : > { %p510_p8 = scmp.ne.s32.totalorder %s783_s20, %s509_s29  ;;  %p851_p0 = scmp.ne.s32.totalorder %s843_s24, 0 }
  0x5b   : > { %248 = vst [vmem:[%s238_s11] sm:$0x3] %v247_v2  ;;  %s599_s14 = smov [#allocation8]  }
  0x5c   : > { %p511_p7 = pnand %p510_p8, %p851_p0  ;;  %s513_s27 = sshll.u32 %s599_s14, 4  ;;  %s514_s27 = int_to_ptr.vmem [resolvable:$false] %s513_s27 }
  0x5d   : > { %s515_s30 = scalar_lea.vmem %s514_s27, 64  ;;  %p516_p10 = scmp.lt.s32.totalorder %s783_s20, %s514_s27 }
  0x5e   : > { %p512_p4 = pneg %p511_p7  ;;  %p517_p12 = scmp.lt.s32.totalorder %s515_s30, %s509_s29 }
  0x60   : > { %p518_p1 = por %p517_p12, %p516_p10 }
  0x62   : > { %p519_p2 = pnand %p518_p1, %p512_p4 }
  0x64   : > { %522 = shalt.err (!%p519_p2)
}
  0x65   : > { %s523_s6 = scalar_lea.hbm %s788_s28, 32  ;;  %s527_s18 = scalar_lea.hbm %s838_s3, 64 }
  0x66   : > { %p524_p9 = scmp.ne.s32.totalorder %s788_s28, %s523_s6  ;;  %p528_p6 = scmp.lt.u32.totalorder %s788_s28, %s838_s3 }
  0x67   : > { %p529_p13 = scmp.lt.u32.totalorder %s527_s18, %s523_s6  ;;  %p531_p8 = scmp.lt.u32.totalorder %s523_s6, %s788_s28 }
  0x68   : > { %p525_p11 = pnand %p524_p9, %p851_p0 }
  0x69   : > { %p530_p5 = por %p529_p13, %p528_p6 }
  0x6a   : > { %p526_p3 = pneg %p525_p11 }
  0x6b   : > { %p532_p7 = por %p531_p8, %p530_p5 }
  0x6d   : > { %p533_p4 = pnand %p532_p7, %p526_p3 }
  0x6f   : > { %536 = shalt.err (!%p533_p4)
}
  0x70   : > { %386 = dma.vmem_to_hbm [thread:$0]  (%p851_p0), %s783_s20, 32, %s788_s28, %s250_s23  }
  0x71 PF: > { %s277_s8 = sand.u32 1, %s575_s12   ;;  %p852_p10 = scmp.ne.s32.totalorder %s844_s26, 0 }
  0x72   : > { %p853_p12 = scmp.ge.s32.totalorder %s595_s16, 2  ;;  %s278_s4 = scalar_lea.sflag [#allocation5], %s277_s8 }
  0x74   : > { %p396_p1 = pnand %p853_p12, %p852_p10 }
  0x76   : > { %570 = dma.done.wait (!%p396_p1), %s278_s4, 32  }
  0x77   : > { %572 = vsyncadd (!%p396_p1), %s278_s4, 4294967264  ;;  %s23_s16 = sadd.s32 1, %s595_s16   ;;  %s854_s12 = smov %s579_s13 }
  0x78   : > { %p20_p2 = scmp.ge.s32.totalorder %s23_s16, 4   ;;  %s855_s13 = smov %s583_s0 }
  0x79   : > { %s856_s0 = smov %s676_s25  ;;  %s857_s14 = smov %s591_s15 }
  0x7a   : > { %s858_s15 = smov %s860_s19  ;;  %22 = sbr.rel (!%p20_p2) target bundleno = 8 (0x8), region = 90 }
  0x81   :  { %283 = vsyncpa [#allocation4], 1 }
  0x82   :  { %285 = vsyncpa [#allocation4 + $0x1], 1 }
  0x83   :  { %286 = vsyncpa [#allocation7], 1 }
  0x84   :  { %288 = vsyncpa [#allocation7 + $0x1], 1 }
  0x85   :  { %289 = vsyncpa [#allocation5], 1 }
  0x86   :  { %291 = vsyncpa [#allocation5 + $0x1], 1 }

</bundles_post_ra>
